<compile_context>
chip_gen: v6e
topology: v6e:2x2x1
jax: 0.10.0
libtpu: 0.0.40
codegen_flags: <defaults>
</compile_context>

<pallas_src>
import jax
import jax.numpy as jnp
from jax.experimental import pallas as pl
from jax.experimental.pallas import tpu as pltpu


def _mlp_kernel(x_ref, w1_ref, b1_ref, w2_ref, b2_ref, w3_ref, b3_ref, o_ref):
    # Whole hot path (3 matmuls + activations) fused inside one Pallas kernel.
    # x (and w1) may be bf16; the MXU accumulates in f32 via
    # preferred_element_type, so no f32 copy of the x tile is materialized.
    x = x_ref[...]

    # fc1 + ReLU  (biases stay f32; broadcast add promotes to f32)
    h1 = jnp.dot(x, w1_ref[...], preferred_element_type=jnp.float32) + b1_ref[...]
    h1 = jnp.maximum(h1, 0.0)

    # fc2 + ReLU
    h2 = jnp.dot(h1, w2_ref[...], preferred_element_type=jnp.float32) + b2_ref[...]
    h2 = jnp.maximum(h2, 0.0)

    # fc3 + Sigmoid (exact form; h3 is (tile_b, 1) so the exact divide is free)
    h3 = jnp.dot(h2, w3_ref[...], preferred_element_type=jnp.float32) + b3_ref[...]
    o_ref[...] = (1.0 / (1.0 + jnp.exp(-h3))).astype(o_ref.dtype)


def _const_block_spec(shape):
    """Full-array block with a constant index_map (DMA'd once, not per step).

    Single-buffered when the running JAX exposes pipeline_mode/pl.Buffered;
    double-buffering a constant block buys nothing and wastes VMEM.
    """
    idx = lambda i: (0,) * len(shape)
    try:
        return pl.BlockSpec(shape, idx, pipeline_mode=pl.Buffered(1))
    except TypeError:
        return pl.BlockSpec(shape, idx)


def neural_net_forward(x, params, *, tile_b=None):
    """Run the fused MLP forward pass as a single Pallas kernel.

    x: (B, input_size), float32 or bfloat16. Only feed bf16 if the producer
       already emits bf16 (a wrapper-side f32->bf16 cast would cancel the HBM
       saving on this bandwidth-bound kernel).
    params: dict with w1 (D,64), b1 (64,), w2 (64,32), b2 (32,), w3 (32,1), b3 (1,)
    Returns float32 output of shape (B, 1).
    """
    B, D = x.shape
    itemsize = jnp.dtype(x.dtype).itemsize

    # --- batch tiling: size tile_b by bytes, no wrapper-side padding ---------
    if tile_b is None:
        lane_d = max(128, ((D + 127) // 128) * 128)   # lane-padded row width in VMEM
        x_tile_budget = 4 * 1024 * 1024               # ~4 MiB lane-padded x tile
        tile_b = x_tile_budget // (lane_d * itemsize)
        tile_b = min(tile_b, 8192)                    # also bounds f32 h1/h2/out temps
    if B <= tile_b:
        tile_b = B          # single full-extent block; no (8,) divisibility needed
    else:
        tile_b = max(8, (tile_b // 8) * 8)            # (8,128) sublane constraint

    steps = pl.cdiv(B, tile_b)    # partial tail block is masked on writeback

    # --- params ---------------------------------------------------------------
    # Only w1 needs to match x's dtype (bf16 x bf16 -> f32 is the MXU-native
    # path); everything downstream of the f32 h1 stays f32.
    w1 = params["w1"].astype(x.dtype)
    w2, w3 = params["w2"], params["w3"]
    b1 = params["b1"].reshape(1, -1)
    b2 = params["b2"].reshape(1, -1)
    b3 = params["b3"].reshape(1, -1)
    H1, H2, H3 = w1.shape[1], w2.shape[1], w3.shape[1]

    in_specs = [
        pl.BlockSpec((tile_b, D), lambda i: (i, 0)),   # x tile (double-buffered)
        _const_block_spec(w1.shape),                   # w1
        _const_block_spec(b1.shape),                   # b1
        _const_block_spec(w2.shape),                   # w2
        _const_block_spec(b2.shape),                   # b2
        _const_block_spec(w3.shape),                   # w3
        _const_block_spec(b3.shape),                   # b3
    ]
    out_spec = pl.BlockSpec((tile_b, H3), lambda i: (i, 0))

    param_bytes = sum(int(a.size) * jnp.dtype(a.dtype).itemsize
                      for a in (w1, b1, w2, b2, w3, b3))
    cost = pl.CostEstimate(
        flops=2 * B * (D * H1 + H1 * H2 + H2 * H3),
        transcendentals=B,                                   # exp in the sigmoid
        bytes_accessed=B * D * itemsize + B * H3 * 4 + param_bytes,
    )

    out = pl.pallas_call(
        _mlp_kernel,
        out_shape=jax.ShapeDtypeStruct((B, H3), jnp.float32),
        grid_spec=pltpu.PrefetchScalarGridSpec(
            num_scalar_prefetch=0,
            grid=(steps,),
            in_specs=in_specs,
            out_specs=out_spec,
        ),
        compiler_params=pltpu.CompilerParams(
            dimension_semantics=("parallel",),
            # Explicit per-generation-safe budget: above the 16/32 MiB scoped
            # defaults (v5e / v6e-v7x), comfortably under v7x's 64 MiB physical.
            vmem_limit_bytes=48 * 1024 * 1024,
        ),
        cost_estimate=cost,
    )(x, w1, b1, w2, b2, w3, b3)

    return out


def init_params(key, input_size):
    """Deterministic parameter init matching the nn.Linear shapes.

    Weights are stored as (in_features, out_features), i.e. the transpose of
    torch's (out_features, in_features), so the kernel does x @ W + b.
    """
    k1, k2, k3, k4, k5, k6 = jax.random.split(key, 6)

    def uinit(k, fan_in, shape):
        bound = 1.0 / jnp.sqrt(fan_in)
        return jax.random.uniform(k, shape, jnp.float32, -bound, bound)

    return {
        "w1": uinit(k1, input_size, (input_size, 64)),
        "b1": uinit(k2, input_size, (64,)),
        "w2": uinit(k3, 64, (64, 32)),
        "b2": uinit(k4, 64, (32,)),
        "w3": uinit(k5, 32, (32, 1)),
        "b3": uinit(k6, 32, (1,)),
    }


def _reference_forward(x, p):
    x = x.astype(jnp.float32)
    h1 = jnp.maximum(x @ p["w1"] + p["b1"], 0.0)
    h2 = jnp.maximum(h1 @ p["w2"] + p["b2"], 0.0)
    return jax.nn.sigmoid(h2 @ p["w3"] + p["b3"])


# TODO(synk): l2_regularization() is a training-time loss term (not part of the
# forward pass); it is intentionally not implemented as a Pallas kernel.


if __name__ == "__main__":
    key = jax.random.PRNGKey(0)
    kx, kp = jax.random.split(key)

    batch, input_size = 8, 32
    x = jax.random.normal(kx, (batch, input_size), jnp.float32)
    params = init_params(kp, input_size)

    # f32 path, single full-extent block.
    out = jax.block_until_ready(neural_net_forward(x, params))
    ref = _reference_forward(x, params)
    assert out.shape == (batch, 1), out.shape
    assert jnp.allclose(out, ref, atol=2e-3, rtol=2e-3), (
        float(jnp.max(jnp.abs(out - ref)))
    )

    # Ragged batch with multi-step grid and masked tail block
    # (20 rows, tile_b=8 -> 3 steps, last block has 4 live rows).
    batch2 = 20
    x2 = jax.random.normal(jax.random.PRNGKey(1), (batch2, input_size), jnp.float32)
    out2 = jax.block_until_ready(neural_net_forward(x2, params, tile_b=8))
    ref2 = _reference_forward(x2, params)
    assert out2.shape == (batch2, 1), out2.shape
    assert jnp.allclose(out2, ref2, atol=2e-3, rtol=2e-3), (
        float(jnp.max(jnp.abs(out2 - ref2)))
    )

    # bf16 input path (simulating a producer that already emits bf16):
    # bf16 x bf16 -> f32 on the MXU, f32 output.
    out_bf16 = jax.block_until_ready(
        neural_net_forward(x.astype(jnp.bfloat16), params)
    )
    assert out_bf16.dtype == jnp.float32
    assert jnp.allclose(out_bf16, ref, atol=3e-2, rtol=3e-2), (
        float(jnp.max(jnp.abs(out_bf16 - ref)))
    )

    print("KERNEL_OK")
</pallas_src>

<mosaic_0001>
module attributes {stable_mosaic.version = 11 : i64} {
  func.func @_mlp_kernel(%arg0: i32, %arg1: memref<8x32xf32, #tpu.memory_space<vmem>>, %arg2: memref<32x64xf32, #tpu.memory_space<vmem>>, %arg3: memref<1x64xf32, #tpu.memory_space<vmem>>, %arg4: memref<64x32xf32, #tpu.memory_space<vmem>>, %arg5: memref<1x32xf32, #tpu.memory_space<vmem>>, %arg6: memref<32x1xf32, #tpu.memory_space<vmem>>, %arg7: memref<1x1xf32, #tpu.memory_space<vmem>>, %arg8: memref<8x1xf32, #tpu.memory_space<vmem>>) attributes {dimension_semantics = [#tpu.dimension_semantics<parallel>], iteration_bounds = array<i64: 1>, scalar_prefetch = 0 : i64, scratch_operands = 0 : i64, tpu.core_type = #tpu.core_type<tc>, window_params = [{transform_indices = @transform_0, window_bounds = array<i64: 8, 32>}, {pipeline_mode = #tpu.pipeline_mode<synchronous>, transform_indices = @transform_1, window_bounds = array<i64: 32, 64>}, {pipeline_mode = #tpu.pipeline_mode<synchronous>, transform_indices = @transform_2, window_bounds = array<i64: 1, 64>}, {pipeline_mode = #tpu.pipeline_mode<synchronous>, transform_indices = @transform_3, window_bounds = array<i64: 64, 32>}, {pipeline_mode = #tpu.pipeline_mode<synchronous>, transform_indices = @transform_4, window_bounds = array<i64: 1, 32>}, {pipeline_mode = #tpu.pipeline_mode<synchronous>, transform_indices = @transform_5, window_bounds = array<i64: 32, 1>}, {pipeline_mode = #tpu.pipeline_mode<synchronous>, transform_indices = @transform_6, window_bounds = array<i64: 1, 1>}, {transform_indices = @transform_7, window_bounds = array<i64: 8, 1>}]} {
    %c0 = arith.constant 0 : index
    %c0_0 = arith.constant 0 : index
    %0 = vector.load %arg1[%c0, %c0_0] : memref<8x32xf32, #tpu.memory_space<vmem>>, vector<8x32xf32>
    %c0_1 = arith.constant 0 : index
    %c0_2 = arith.constant 0 : index
    %1 = vector.load %arg2[%c0_1, %c0_2] : memref<32x64xf32, #tpu.memory_space<vmem>>, vector<32x64xf32>
    %cst = arith.constant dense<0.000000e+00> : vector<8x64xf32>
    %2 = tpu.matmul %0, %1, %cst {dimension_numbers = #tpu.dot_dimension_numbers<[1], [0], [0], [1], [0, 0, 1, 1], [], []>} : vector<8x32xf32>, vector<32x64xf32>, vector<8x64xf32> -> vector<8x64xf32>
    %c0_3 = arith.constant 0 : index
    %c0_4 = arith.constant 0 : index
    %3 = vector.load %arg3[%c0_3, %c0_4] : memref<1x64xf32, #tpu.memory_space<vmem>>, vector<1x64xf32>
    %4 = vector.broadcast %3 : vector<1x64xf32> to vector<8x64xf32>
    %5 = arith.addf %2, %4 : vector<8x64xf32>
    %cst_5 = arith.constant 0.000000e+00 : f32
    %6 = vector.broadcast %cst_5 : f32 to vector<8x64xf32>
    %7 = arith.maximumf %5, %6 : vector<8x64xf32>
    %c0_6 = arith.constant 0 : index
    %c0_7 = arith.constant 0 : index
    %8 = vector.load %arg4[%c0_6, %c0_7] : memref<64x32xf32, #tpu.memory_space<vmem>>, vector<64x32xf32>
    %cst_8 = arith.constant dense<0.000000e+00> : vector<8x32xf32>
    %9 = tpu.matmul %7, %8, %cst_8 {dimension_numbers = #tpu.dot_dimension_numbers<[1], [0], [0], [1], [0, 0, 1, 1], [], []>} : vector<8x64xf32>, vector<64x32xf32>, vector<8x32xf32> -> vector<8x32xf32>
    %c0_9 = arith.constant 0 : index
    %c0_10 = arith.constant 0 : index
    %10 = vector.load %arg5[%c0_9, %c0_10] : memref<1x32xf32, #tpu.memory_space<vmem>>, vector<1x32xf32>
    %11 = vector.broadcast %10 : vector<1x32xf32> to vector<8x32xf32>
    %12 = arith.addf %9, %11 : vector<8x32xf32>
    %cst_11 = arith.constant 0.000000e+00 : f32
    %13 = vector.broadcast %cst_11 : f32 to vector<8x32xf32>
    %14 = arith.maximumf %12, %13 : vector<8x32xf32>
    %c0_12 = arith.constant 0 : index
    %c0_13 = arith.constant 0 : index
    %15 = vector.load %arg6[%c0_12, %c0_13] : memref<32x1xf32, #tpu.memory_space<vmem>>, vector<32x1xf32>
    %cst_14 = arith.constant dense<0.000000e+00> : vector<8x1xf32>
    %16 = tpu.matmul %14, %15, %cst_14 {dimension_numbers = #tpu.dot_dimension_numbers<[1], [0], [0], [1], [0, 0, 1, 1], [], []>} : vector<8x32xf32>, vector<32x1xf32>, vector<8x1xf32> -> vector<8x1xf32>
    %c0_15 = arith.constant 0 : index
    %c0_16 = arith.constant 0 : index
    %17 = vector.load %arg7[%c0_15, %c0_16] : memref<1x1xf32, #tpu.memory_space<vmem>>, vector<1x1xf32>
    %18 = vector.broadcast %17 : vector<1x1xf32> to vector<8x1xf32>
    %19 = arith.addf %16, %18 : vector<8x1xf32>
    %cst_17 = arith.constant 0.000000e+00 : f32
    %20 = vector.broadcast %cst_17 : f32 to vector<8x1xf32>
    %21 = arith.subf %20, %19 : vector<8x1xf32>
    %22 = math.exp %21 : vector<8x1xf32>
    %cst_18 = arith.constant 1.000000e+00 : f32
    %23 = vector.broadcast %cst_18 : f32 to vector<8x1xf32>
    %24 = arith.addf %23, %22 : vector<8x1xf32>
    %cst_19 = arith.constant 1.000000e+00 : f32
    %25 = vector.broadcast %cst_19 : f32 to vector<8x1xf32>
    %26 = arith.divf %25, %24 : vector<8x1xf32>
    %c0_20 = arith.constant 0 : index
    %c0_21 = arith.constant 0 : index
    %27 = vector.load %arg8[%c0_20, %c0_21] : memref<8x1xf32, #tpu.memory_space<vmem>>, vector<8x1xf32>
    tpu.vector_store %arg8[%c0_20, %c0_21], %26 {strides = array<i32>} : memref<8x1xf32, #tpu.memory_space<vmem>>, vector<8x1xf32>,
    return
  }
  func.func @transform_0(%arg0: i32) -> (i32, i32) {
    %c0_i32 = arith.constant 0 : i32
    %c0_i32_0 = arith.constant 0 : i32
    return %arg0, %c0_i32 : i32, i32
  }
  func.func @transform_1(%arg0: i32) -> (i32, i32) {
    %c0_i32 = arith.constant 0 : i32
    %c0_i32_0 = arith.constant 0 : i32
    %c0_i32_1 = arith.constant 0 : i32
    return %c0_i32, %c0_i32_0 : i32, i32
  }
  func.func @transform_2(%arg0: i32) -> (i32, i32) {
    %c0_i32 = arith.constant 0 : i32
    %c0_i32_0 = arith.constant 0 : i32
    %c0_i32_1 = arith.constant 0 : i32
    return %c0_i32, %c0_i32_0 : i32, i32
  }
  func.func @transform_3(%arg0: i32) -> (i32, i32) {
    %c0_i32 = arith.constant 0 : i32
    %c0_i32_0 = arith.constant 0 : i32
    %c0_i32_1 = arith.constant 0 : i32
    return %c0_i32, %c0_i32_0 : i32, i32
  }
  func.func @transform_4(%arg0: i32) -> (i32, i32) {
    %c0_i32 = arith.constant 0 : i32
    %c0_i32_0 = arith.constant 0 : i32
    %c0_i32_1 = arith.constant 0 : i32
    return %c0_i32, %c0_i32_0 : i32, i32
  }
  func.func @transform_5(%arg0: i32) -> (i32, i32) {
    %c0_i32 = arith.constant 0 : i32
    %c0_i32_0 = arith.constant 0 : i32
    %c0_i32_1 = arith.constant 0 : i32
    return %c0_i32, %c0_i32_0 : i32, i32
  }
  func.func @transform_6(%arg0: i32) -> (i32, i32) {
    %c0_i32 = arith.constant 0 : i32
    %c0_i32_0 = arith.constant 0 : i32
    %c0_i32_1 = arith.constant 0 : i32
    return %c0_i32, %c0_i32_0 : i32, i32
  }
  func.func @transform_7(%arg0: i32) -> (i32, i32) {
    %c0_i32 = arith.constant 0 : i32
    %c0_i32_0 = arith.constant 0 : i32
    return %arg0, %c0_i32 : i32, i32
  }
}

</mosaic_0001>

<bundles_post_ra>
// kernel: tpu_custom_call.1
= control target key start
LH: loop header
LB: loop body
LE: loop exit
PB: predicated region body
PF: predicated region fallthrough
CT: control target
= control target key end

     0   :  { %v373_v0 = vmov 0.0   ;;  %vm374_vm0 = vmmov 0   ;;  %vm40_vm1 = vcmask 261120   ;;  %vm130_vm2 = vcmask 523264   ;;  %s483_s1 = inlined_call_operand.vmem [shape: f32[32,64], index: 1, kind: input, shape index: {}]   ;;  %s484_s3 = inlined_call_operand.vmem [shape: f32[64,32], index: 3, kind: input, shape index: {}]   ;;  %s485_s0 = inlined_call_operand.vmem [shape: f32[8,32], index: 0, kind: input, shape index: {}]   ;;  %s486_s5 = inlined_call_operand.vmem [shape: f32[32,1], index: 5, kind: input, shape index: {}]   ;;  %s487_s2 = inlined_call_operand.vmem [shape: f32[1,64], index: 2, kind: input, shape index: {}]   ;;  %s488_s6 = inlined_call_operand.<no memory space> [shape: f32[1,1], index: 6, kind: input, shape index: {}]   ;;  %s489_s4 = inlined_call_operand.vmem [shape: f32[1,32], index: 4, kind: input, shape index: {}]   ;;  %s490_s7 = inlined_call_operand.vmem [shape: f32[8,1], index: 7, kind: output, shape index: {}]  }
   0x1   :  { %326 = vmatprep.subr.mxu0 %v373_v0  ;;  %v32_v1 = vld [vmem:[%s483_s1 + $0x18] sm:$0xff]  ;;  %v31_v2 = vld [vmem:[%s483_s1 + $0x10] sm:$0xff]  ;;  %334 = vmatprep.mubr.msk.f32.mxu0 %vm374_vm0, %v373_v0  ;;  %v30_v4 = vld [vmem:[%s483_s1 + $0x8] sm:$0xff]  ;;  %v12_v23 = vstv %s488_s6  ;;  %vm295_vm3 = vcmask 7168  }
   0x2   :  { %327 = vmatpush3.msra.mxu0 %v32_v1  ;;  %337 = vmatprep.subr.mxu1 %v373_v0  ;;  %v122_v3 = vld [vmem:[%s484_s3 + $0x38] sm:$0xff]  ;;  %v121_v5 = vld [vmem:[%s484_s3 + $0x30] sm:$0xff]  ;;  %v120_v6 = vld [vmem:[%s484_s3 + $0x28] sm:$0xff]  ;;  %13 = vst [vmem:[#allocation2] sm:$0x1] %v12_v23 }
   0x3   :  { %328 = vmatprep.subr.mxu0 %v373_v0  ;;  %338 = vmatpush3.msra.mxu1 %v122_v3  ;;  %v29_v7 = vld [vmem:[%s483_s1] sm:$0xff]  ;;  %v118_v10 = vld [vmem:[%s484_s3 + $0x18] sm:$0xff]  ;;  %v117_v11 = vld [vmem:[%s484_s3 + $0x10] sm:$0xff] }
   0x4   :  { %329 = vmatpush3.msra.mxu0 %v31_v2  ;;  %339 = vmatprep.subr.mxu1 %v373_v0  ;;  %v28_v8 = vld [vmem:[%s485_s0] sm:$0xff]  ;;  %v116_v12 = vld [vmem:[%s484_s3 + $0x8] sm:$0xff]  ;;  %v208_v14 = vld [vmem:[%s486_s5 + $0x18] sm:$0xff] }
   0x5   :  { %330 = vmatprep.subr.mxu0 %v373_v0  ;;  %340 = vmatpush3.msra.mxu1 %v121_v5  ;;  %v119_v9 = vld [vmem:[%s484_s3 + $0x20] sm:$0xff]  ;;  %v207_v20 = vld [vmem:[%s486_s5 + $0x10] sm:$0xff]  ;;  %v206_v21 = vld [vmem:[%s486_s5 + $0x8] sm:$0xff] }
   0x6   :  { %331 = vmatpush3.msra.mxu0 %v30_v4  ;;  %341 = vmatprep.subr.mxu1 %v373_v0  ;;  %v115_v13 = vld [vmem:[%s484_s3] sm:$0xff] }
   0x7   :  { %332 = vmatprep.subr.mxu0 %v373_v0  ;;  %342 = vmatpush3.msra.mxu1 %v120_v6  ;;  %v301_v15 = vld [vmem:[%s487_s2] ss:$0 sm:$0xff] }
   0x8   :  { %333 = vmatpush3.msra.mxu0 %v29_v7  ;;  %343 = vmatprep.subr.mxu1 %v373_v0  ;;  %v205_v22 = vld [vmem:[%s486_s5] sm:$0xff] }
   0x9   :  { %335 = vmatmul.mubr.msk.f32.vlgmr.msra.gmra.mxu0 %vm40_vm1, %v28_v8  ;;  %344 = vmatpush3.msra.mxu1 %v119_v9  ;;  %v303_v24 = vld [vmem:[%s489_s4] ss:$0 sm:$0xff] }
   0xa   :  { %345 = vmatprep.subr.mxu1 %v373_v0  ;;  %353 = vmatprep.mubr.msk.f32.mxu1 %vm374_vm0, %v373_v0  ;;  %v305_v29 = vld [vmem:[#allocation2] ss:$0 sm:$0xff] }
   0xb   :  { %346 = vmatpush3.msra.mxu1 %v118_v10  ;;  %356 = vmatprep.subr.mxu0 %v373_v0 }
   0xc   :  { %347 = vmatprep.subr.mxu1 %v373_v0  ;;  %364 = vmatprep.mubr.msk.f32.mxu0 %vm374_vm0, %v373_v0 }
   0xd   :  { %348 = vmatpush3.msra.mxu1 %v117_v11  ;;  %357 = vmatpush3.msra.mxu0 %v208_v14 }
   0xe   :  { %349 = vmatprep.subr.mxu1 %v373_v0  ;;  %358 = vmatprep.subr.mxu0 %v373_v0 }
   0xf   :  { %350 = vmatpush3.msra.mxu1 %v116_v12  ;;  %359 = vmatpush3.msra.mxu0 %v207_v20 }
  0x10   :  { %351 = vmatprep.subr.mxu1 %v373_v0  ;;  %360 = vmatprep.subr.mxu0 %v373_v0 }
  0x11   :  { %352 = vmatpush3.msra.mxu1 %v115_v13  ;;  %361 = vmatpush3.msra.mxu0 %v206_v21 }
  0x12   :  { %362 = vmatprep.subr.mxu0 %v373_v0 }
  0x13   :  { %363 = vmatpush3.msra.mxu0 %v205_v22 }
  0xc9   :  { %v110_v16 = vpop.f32.mrf.mxu0 }
  0xca   :  { %v111_v17 = vadd.f32 %v301_v15, %v110_v16 }
  0xcb   :  { %v336_v18 = vpop.f32.mrf.mxu0 }
  0xcc   :  { %v114_v19 = vmax.f32 %v111_v17, 0.0 }
  0xce   :  { %354 = vmatmul.mubr.msk.f32.vlgmr.msra.gmra.mxu1 %vm130_vm2, %v114_v19 }
 0x18e   :  { %v200_v25 = vpop.f32.mrf.mxu1 }
 0x18f   :  { %v201_v26 = vadd.f32 %v303_v24, %v200_v25 }
 0x190   :  { %v355_v27 = vpop.f32.mrf.mxu1 }
 0x191   :  { %v204_v28 = vmax.f32 %v201_v26, 0.0 }
 0x193   :  { %365 = vmatmul.mubr.msk.f32.vlgmr.msra.gmra.mxu0 %vm40_vm1, %v204_v28 }
 0x253   :  { %v285_v30 = vpop.f32.mrf.mxu0 }
 0x254   :  { %v286_v31 = vadd.f32 %v305_v29, %v285_v30 }
 0x255   :  { %v366_v32 = vpop.f32.mrf.mxu0 }
 0x256   :  { %v289_v33 = vsub.f32 0.0, %v286_v31 }
 0x258   :  { %v290_v34 = vmul.f32 1.442695, %v289_v33 }
 0x25a   :  { %369 = vpow2.f32 %v290_v34 }
 0x267   :  { %v370_v35 = vpop.eup %369 }
 0x268   :  { %v292_v36 = vadd.f32 1.0, %v370_v35 }
 0x26a   :  { %371 = vrcp.f32 %v292_v36 }
 0x277   :  { %v372_v37 = vpop.eup %371 }
 0x278   :  { %296 = vst.msk [vmem:[%s490_s7] sm:$0xff] %vm295_vm3, %v372_v37 }

</bundles_post_ra>
